<compile_context>
chip_gen: v5e
topology: v5e:2x2
jax: 0.10.0
libtpu: 0.0.40
codegen_flags: <defaults>
</compile_context>

<pallas_src>
import functools

import jax
import jax.numpy as jnp
from jax.experimental import pallas as pl
from jax.experimental.pallas import tpu as pltpu


# Leading "parallel" grid axis size.  Uses both TensorCores on v7x; on 1-TC
# chips (v5e/v6e) it just iterates sequentially (at most one duplicated,
# fully-masked tile of overhead when the tile count is odd).
_NUM_CORES = 2


def _vmem_budgets():
    """(scoped vmem_limit_bytes, byte budget for the streamed tiles)."""
    phys = 64 * 1024 * 1024                      # v7x per-TC VMEM; safe floor
    try:
        phys = int(pltpu.get_tpu_info().vmem_capacity_bytes)
    except Exception:                            # older jax / no query: keep floor
        pass
    limit = min(phys // 2, 64 * 1024 * 1024)     # 32 MiB on v7x, 64 MiB on v5e/v6e
    budget = (limit * 5) // 8                    # ~20 / ~40 MiB for the x tiles
    return limit, budget


def _pick_tile_n(n, c, itemsize, tile_budget):
    # Live VMEM bytes per logits row:
    #   2x double-buffered x block, 2x double-buffered lane-padded (128-wide)
    #   int32 target column, plus ~4 full-width f32 in-kernel temporaries
    #   (f32 cast, iota, where/select, exp) that spill beyond the 64 vregs.
    bytes_per_row = 2 * c * itemsize + 2 * 128 * 4 + 4 * c * 4
    tile = tile_budget // max(bytes_per_row, 1)
    sub = {4: 8, 2: 16, 1: 32}.get(itemsize, 8)  # sublane multiple per dtype
    tile = (tile // sub) * sub
    if tile < sub:
        tile = sub
    if tile >= n:
        return n                                 # single full block
    return tile


def _dice_loss_kernel(x_ref, t_ref, o_ref, acc_ref, *, n_total, tiles_per_core):
    co = pl.program_id(0)                        # core / outer-parallel index
    i = pl.program_id(1)                         # tile index within this core

    @pl.when(i == 0)
    def _init():
        acc_ref[...] = jnp.zeros_like(acc_ref)

    x = x_ref[...]                               # [TILE_N, C] native dtype
    t = t_ref[...]                               # [TILE_N, 1] int32
    tile_n, c = x.shape

    # Row max + target-logit gather in the native dtype (bf16 stays bf16).
    m = jnp.max(x, axis=1, keepdims=True)                        # [TILE_N, 1]
    col = jax.lax.broadcasted_iota(jnp.int32, (tile_n, c), 1)
    x_t = jnp.sum(jnp.where(col == t, x, jnp.zeros((), x.dtype)),
                  axis=1, keepdims=True)                         # [TILE_N, 1]

    # exp / softmax denominator in f32 for accuracy; full prob matrix never
    # materialized.  Divides go to the EUP via approx reciprocal.
    m32 = m.astype(jnp.float32)
    denom = jnp.sum(jnp.exp(x.astype(jnp.float32) - m32), axis=1, keepdims=True)
    p = jnp.exp(x_t.astype(jnp.float32) - m32) * pl.reciprocal(denom, approx=True)

    # dsc = 1 - (1 - p) * p / ((1 - p) * p + 1)
    num = (1.0 - p) * p
    dsc = 1.0 - num * pl.reciprocal(num + 1.0, approx=True)      # [TILE_N, 1]

    # Mask rows past the true batch size using the *logical* (unclamped) tile
    # index: covers both the ragged last tile and fully-OOB duplicated tiles.
    tile_idx = co * tiles_per_core + i
    row = tile_idx * tile_n + jax.lax.broadcasted_iota(jnp.int32, (tile_n, 1), 0)
    tile_sum = jnp.sum(jnp.where(row < n_total, dsc, 0.0), keepdims=True)
    acc_ref[...] += tile_sum

    @pl.when(i == pl.num_programs(1) - 1)
    def _finalize():
        # Lane-dense (1,128) write; all lanes carry this core's partial sum.
        o_ref[...] = jnp.broadcast_to(acc_ref[...], o_ref.shape)


def dice_loss(x, target, *, tile_n=None):
    """x: [N, C] float logits; target: [N] int class ids. Returns scalar f32."""
    n, c = x.shape
    t2 = target.astype(jnp.int32).reshape(n, 1)
    itemsize = jnp.dtype(x.dtype).itemsize
    sub = {4: 8, 2: 16, 1: 32}.get(itemsize, 8)

    vmem_limit, tile_budget = _vmem_budgets()
    if tile_n is None:
        tile_n = _pick_tile_n(n, c, itemsize, tile_budget)
    else:
        tile_n = max(sub, ((tile_n + sub - 1) // sub) * sub)
    tile_n = min(tile_n, n)

    num_tiles = pl.cdiv(n, tile_n)
    num_cores = min(_NUM_CORES, num_tiles)
    tiles_per_core = pl.cdiv(num_tiles, num_cores)
    grid = (num_cores, tiles_per_core)

    def row_block(co, i):
        # Clamp so a DMA never starts past the last real tile; duplicated
        # tiles are fully masked inside the kernel via the logical row index.
        return (jnp.minimum(co * tiles_per_core + i, num_tiles - 1), 0)

    kernel = functools.partial(_dice_loss_kernel, n_total=n,
                               tiles_per_core=tiles_per_core)

    out = pl.pallas_call(
        kernel,
        out_shape=jax.ShapeDtypeStruct((1, num_cores * 128), jnp.float32),
        grid_spec=pltpu.PrefetchScalarGridSpec(
            num_scalar_prefetch=0,
            grid=grid,
            in_specs=[
                pl.BlockSpec((tile_n, c), row_block),
                pl.BlockSpec((tile_n, 1), row_block),
            ],
            out_specs=pl.BlockSpec((1, 128), lambda co, i: (0, co)),
            scratch_shapes=[pltpu.VMEM((1, 1), jnp.float32)],
        ),
        compiler_params=pltpu.CompilerParams(
            dimension_semantics=("parallel", "arbitrary"),
            vmem_limit_bytes=vmem_limit,
        ),
    )(x, t2)

    partials = out.reshape(num_cores, 128)[:, 0]    # one partial per core
    return jnp.sum(partials) / n


def dice_loss_ref(x, target):
    prob = jax.nn.softmax(x.astype(jnp.float32), axis=1)
    p = jnp.take_along_axis(prob, target[:, None].astype(jnp.int32), axis=1)
    dsc = 1.0 - (1.0 - p) * p / ((1.0 - p) * p + 1.0)
    return jnp.mean(dsc)


if __name__ == "__main__":
    key = jax.random.PRNGKey(0)
    k1, k2 = jax.random.split(key)
    N, C = 20, 32                      # N deliberately not a multiple of 8
    x = jax.random.normal(k1, (N, C), dtype=jnp.float32)
    target = jax.random.randint(k2, (N,), 0, C, dtype=jnp.int32)

    ref = dice_loss_ref(x, target)

    # Auto tile size (single full block at this small shape).
    loss_auto = dice_loss(x, target)
    jax.block_until_ready(loss_auto)
    assert jnp.allclose(loss_auto, ref, atol=1e-4, rtol=1e-4), (loss_auto, ref)

    # Forced small tile: exercises the dual-core grid, the clamped duplicate
    # tile, the per-core accumulator and the ragged-row mask.
    loss_tiled = dice_loss(x, target, tile_n=8)
    jax.block_until_ready(loss_tiled)
    assert jnp.allclose(loss_tiled, ref, atol=1e-4, rtol=1e-4), (loss_tiled, ref)

    # bf16 inputs: native-dtype max/gather path, f32 exp/denominator.
    x_bf = x.astype(jnp.bfloat16)
    ref_bf = dice_loss_ref(x_bf, target)
    loss_bf = dice_loss(x_bf, target)
    jax.block_until_ready(loss_bf)
    assert jnp.allclose(loss_bf, ref_bf, atol=1e-4, rtol=1e-4), (loss_bf, ref_bf)

    print("KERNEL_OK")
</pallas_src>

<mosaic_0001>
module attributes {stable_mosaic.version = 11 : i64} {
  func.func @_dice_loss_kernel(%arg0: i32, %arg1: i32, %arg2: memref<20x32xf32, #tpu.memory_space<vmem>>, %arg3: memref<20x1xi32, #tpu.memory_space<vmem>>, %arg4: memref<1x128xf32, #tpu.memory_space<vmem>>, %arg5: memref<1x1xf32, #tpu.memory_space<vmem>>) attributes {dimension_semantics = [#tpu.dimension_semantics<parallel>, #tpu.dimension_semantics<arbitrary>], iteration_bounds = array<i64: 1, 1>, scalar_prefetch = 0 : i64, scratch_operands = 1 : i64, tpu.core_type = #tpu.core_type<tc>, window_params = [{transform_indices = @transform_0, window_bounds = array<i64: 20, 32>}, {transform_indices = @transform_1, window_bounds = array<i64: 20, 1>}, {transform_indices = @transform_2, window_bounds = array<i64: 1, 128>}]} {
    %c0_i32 = arith.constant 0 : i32
    %0 = arith.cmpi eq, %arg1, %c0_i32 : i32
    %1 = arith.extui %0 : i1 to i32
    %c0_i32_0 = arith.constant 0 : i32
    %2 = arith.cmpi ne, %1, %c0_i32_0 : i32
    scf.if %2 {
      %cst_19 = arith.constant 0.000000e+00 : f32
      %53 = vector.broadcast %cst_19 : f32 to vector<1x1xf32>
      %c0_20 = arith.constant 0 : index
      %c0_21 = arith.constant 0 : index
      %54 = vector.load %arg5[%c0_20, %c0_21] : memref<1x1xf32, #tpu.memory_space<vmem>>, vector<1x1xf32>
      tpu.vector_store %arg5[%c0_20, %c0_21], %53 {strides = array<i32>} : memref<1x1xf32, #tpu.memory_space<vmem>>, vector<1x1xf32>,
    } else {
    }
    %c0 = arith.constant 0 : index
    %c0_1 = arith.constant 0 : index
    %3 = vector.load %arg2[%c0, %c0_1] : memref<20x32xf32, #tpu.memory_space<vmem>>, vector<20x32xf32>
    %c0_2 = arith.constant 0 : index
    %c0_3 = arith.constant 0 : index
    %4 = vector.load %arg3[%c0_2, %c0_3] : memref<20x1xi32, #tpu.memory_space<vmem>>, vector<20x1xi32>
    %cst = arith.constant dense<0xFF800000> : vector<20xf32>
    %5 = vector.multi_reduction <maximumf>, %3, %cst [1] : vector<20x32xf32> to vector<20xf32>
    %6 = vector.shape_cast %5 : vector<20xf32> to vector<20x1xf32>
    %7 = tpu.iota {dimensions = array<i32: 1>} : vector<20x32xi32>
    %8 = vector.broadcast %4 : vector<20x1xi32> to vector<20x32xi32>
    %9 = arith.cmpi eq, %7, %8 : vector<20x32xi32>
    %cst_4 = arith.constant 0.000000e+00 : f32
    %10 = vector.broadcast %cst_4 : f32 to vector<20x32xf32>
    %11 = arith.select %9, %3, %10 : vector<20x32xi1>, vector<20x32xf32>
    %cst_5 = arith.constant dense<0.000000e+00> : vector<20xf32>
    %12 = vector.multi_reduction <add>, %11, %cst_5 [1] : vector<20x32xf32> to vector<20xf32>
    %13 = vector.shape_cast %12 : vector<20xf32> to vector<20x1xf32>
    %14 = vector.broadcast %6 : vector<20x1xf32> to vector<20x32xf32>
    %15 = arith.subf %3, %14 : vector<20x32xf32>
    %16 = math.exp %15 : vector<20x32xf32>
    %cst_6 = arith.constant dense<0.000000e+00> : vector<20xf32>
    %17 = vector.multi_reduction <add>, %16, %cst_6 [1] : vector<20x32xf32> to vector<20xf32>
    %18 = vector.shape_cast %17 : vector<20xf32> to vector<20x1xf32>
    %19 = arith.subf %13, %6 : vector<20x1xf32>
    %20 = math.exp %19 : vector<20x1xf32>
    %21 = tpu.reciprocal %18 {approx = true} : vector<20x1xf32> -> vector<20x1xf32>
    %22 = arith.mulf %20, %21 : vector<20x1xf32>
    %cst_7 = arith.constant 1.000000e+00 : f32
    %23 = vector.broadcast %cst_7 : f32 to vector<20x1xf32>
    %24 = arith.subf %23, %22 : vector<20x1xf32>
    %25 = arith.mulf %24, %22 : vector<20x1xf32>
    %cst_8 = arith.constant 1.000000e+00 : f32
    %26 = vector.broadcast %cst_8 : f32 to vector<20x1xf32>
    %27 = arith.addf %25, %26 : vector<20x1xf32>
    %28 = tpu.reciprocal %27 {approx = true} : vector<20x1xf32> -> vector<20x1xf32>
    %29 = arith.mulf %25, %28 : vector<20x1xf32>
    %cst_9 = arith.constant 1.000000e+00 : f32
    %30 = vector.broadcast %cst_9 : f32 to vector<20x1xf32>
    %31 = arith.subf %30, %29 : vector<20x1xf32>
    %c1_i32 = arith.constant 1 : i32
    %32 = arith.muli %arg0, %c1_i32 : i32
    %33 = arith.addi %32, %arg1 : i32
    %c20_i32 = arith.constant 20 : i32
    %34 = arith.muli %33, %c20_i32 : i32
    %35 = tpu.iota {dimensions = array<i32: 0>} : vector<20x1xi32>
    %36 = vector.broadcast %34 : i32 to vector<20x1xi32>
    %37 = arith.addi %36, %35 : vector<20x1xi32>
    %c20_i32_10 = arith.constant 20 : i32
    %38 = vector.broadcast %c20_i32_10 : i32 to vector<20x1xi32>
    %39 = arith.cmpi slt, %37, %38 : vector<20x1xi32>
    %cst_11 = arith.constant 0.000000e+00 : f32
    %40 = vector.broadcast %cst_11 : f32 to vector<20x1xf32>
    %41 = arith.select %39, %31, %40 : vector<20x1xi1>, vector<20x1xf32>
    %42 = vector.shape_cast %41 : vector<20x1xf32> to vector<1x20x1xf32>
    %cst_12 = arith.constant dense<0.000000e+00> : vector<1xf32>
    %43 = vector.multi_reduction <add>, %42, %cst_12 [1, 2] : vector<1x20x1xf32> to vector<1xf32>
    %44 = vector.shape_cast %43 : vector<1xf32> to vector<1x1x1xf32>
    %45 = vector.extract %44[0, 0, 0] : f32 from vector<1x1x1xf32>
    %46 = vector.broadcast %45 : f32 to vector<1x1xf32>
    %c0_13 = arith.constant 0 : index
    %c0_14 = arith.constant 0 : index
    %47 = vector.load %arg5[%c0_13, %c0_14] : memref<1x1xf32, #tpu.memory_space<vmem>>, vector<1x1xf32>
    %48 = arith.addf %47, %46 : vector<1x1xf32>
    %c0_15 = arith.constant 0 : index
    %c0_16 = arith.constant 0 : index
    %49 = vector.load %arg5[%c0_15, %c0_16] : memref<1x1xf32, #tpu.memory_space<vmem>>, vector<1x1xf32>
    tpu.vector_store %arg5[%c0_15, %c0_16], %48 {strides = array<i32>} : memref<1x1xf32, #tpu.memory_space<vmem>>, vector<1x1xf32>,
    %c0_i32_17 = arith.constant 0 : i32
    %50 = arith.cmpi eq, %arg1, %c0_i32_17 : i32
    %51 = arith.extui %50 : i1 to i32
    %c0_i32_18 = arith.constant 0 : i32
    %52 = arith.cmpi ne, %51, %c0_i32_18 : i32
    scf.if %52 {
      %c0_19 = arith.constant 0 : index
      %c0_20 = arith.constant 0 : index
      %53 = vector.load %arg5[%c0_19, %c0_20] : memref<1x1xf32, #tpu.memory_space<vmem>>, vector<1x1xf32>
      %54 = vector.shape_cast %53 : vector<1x1xf32> to vector<1x1xf32>
      %55 = vector.broadcast %54 : vector<1x1xf32> to vector<1x128xf32>
      %c0_21 = arith.constant 0 : index
      %c0_22 = arith.constant 0 : index
      %56 = vector.load %arg4[%c0_21, %c0_22] : memref<1x128xf32, #tpu.memory_space<vmem>>, vector<1x128xf32>
      tpu.vector_store %arg4[%c0_21, %c0_22], %55 {strides = array<i32>} : memref<1x128xf32, #tpu.memory_space<vmem>>, vector<1x128xf32>,
    } else {
    }
    return
  }
  func.func @transform_0(%arg0: i32, %arg1: i32) -> (i32, i32) {
    %c1_i32 = arith.constant 1 : i32
    %0 = arith.muli %arg0, %c1_i32 : i32
    %1 = arith.addi %0, %arg1 : i32
    %c0_i32 = arith.constant 0 : i32
    %2 = arith.minsi %1, %c0_i32 : i32
    %c0_i32_0 = arith.constant 0 : i32
    %c0_i32_1 = arith.constant 0 : i32
    return %2, %c0_i32_0 : i32, i32
  }
  func.func @transform_1(%arg0: i32, %arg1: i32) -> (i32, i32) {
    %c1_i32 = arith.constant 1 : i32
    %0 = arith.muli %arg0, %c1_i32 : i32
    %1 = arith.addi %0, %arg1 : i32
    %c0_i32 = arith.constant 0 : i32
    %2 = arith.minsi %1, %c0_i32 : i32
    %c0_i32_0 = arith.constant 0 : i32
    %c0_i32_1 = arith.constant 0 : i32
    return %2, %c0_i32_0 : i32, i32
  }
  func.func @transform_2(%arg0: i32, %arg1: i32) -> (i32, i32) {
    %c0_i32 = arith.constant 0 : i32
    %c0_i32_0 = arith.constant 0 : i32
    return %c0_i32, %arg0 : i32, i32
  }
}

</mosaic_0001>

<bundles_post_ra>
// kernel: tpu_custom_call.1
= control target key start
LH: loop header
LB: loop body
LE: loop exit
PB: predicated region body
PF: predicated region fallthrough
CT: control target
= control target key end

     0   :  { %vm95_vm0 = vcmask 257024   ;;  %v310_v3 = vmov 0   ;;  %vm88_vm1 = vcmask 261120   ;;  %s360_s0 = inlined_call_operand.vmem [shape: f32[20,32], index: 0, kind: input, shape index: {}]   ;;  %s361_s1 = inlined_call_operand.vmem [shape: s32[20,1], index: 1, kind: input, shape index: {}]   ;;  %s362_s2 = inlined_call_operand.hbm [shape: f32[1,128], index: 2, kind: output, shape index: {}]  }
   0x1   :  { %v86_v0 = vld [vmem:[%s361_s1 + $0x8] sm:$0xff]  ;;  %v84_v1 = vld [vmem:[%s360_s0 + $0x10] sm:$0xf]  ;;  %v82_v2 = vld [vmem:[%s360_s0] sm:$0xff]  ;;  %258 = vset.pattern.permute.xlu2 %v310_v3  ;;  %257 = vset.pattern.permute.xlu1 %v310_v3 }
   0x2   :  { %v96_v4 = vsel %vm95_vm0, %v84_v1, -inf  ;;  %105 = vperm.xlu2 %258, %v86_v0   ;;  %v89_v5 = vsel %vm88_vm1, %v82_v2, -inf }
   0x3   :  { %97 = vmax.xlane.f32.xlu1 %v96_v4 }
   0x4   :  { %7 = vsyncpa [#allocation4], 0  ;;  %90 = vmax.xlane.f32.xlu0 %v89_v5  ;;  %v83_v6 = vld [vmem:[%s360_s0 + $0x8] sm:$0xff]  ;;  %v87_v7 = vld [vmem:[%s361_s1 + $0x10] sm:$0xf]  ;;  %v99_v10 = vlaneseq  ;;  %vm192_vm5 = vcmask 7168  }
   0x5   :  { %259 = vset.pattern.permute.xlu0 %v310_v3  ;;  %v92_v8 = vsel %vm88_vm1, %v83_v6, -inf  ;;  %v85_v9 = vld [vmem:[%s361_s1] sm:$0xff]  ;;  %vm196_vm7 = vcmask 3072   ;;  %vm80_vm8 = vcmask 0   ;;  %s312_s1 = smov [#allocation3]   ;;  %s231_s24 = sshll.u32 %s362_s2, 4  ;;  %s232_s24 = int_to_ptr.hbm [resolvable:$true] %s231_s24 }
   0x6   :  { %v100_v11 = vand.u32 127, %v99_v10  ;;  %v179_v5 = vshrl.u32 %v99_v10, 7  ;;  %s229_s21 = sshll.u32 %s312_s1, 4  ;;  %s230_s21 = int_to_ptr.vmem [resolvable:$true] %s229_s21 }
   0xa   :  { %108 = vperm.xlu2 %258, %v87_v7  }
   0xc   :  { %93 = vmax.xlane.f32.xlu0 %v92_v8  ;;  %v181_v8 = vadd.s32 16, %v179_v5 }
   0xe   :  { %vm188_vm6 = vcmp.lt.s32.totalorder %v181_v8, 20 }
  0x1c   :  { %102 = vperm.xlu1 %257, %v85_v9  }
  0x5c   :  { %v106_v12 = vpop.permute.xlu2 %105 }
  0x5d   :  { %vm111_vm2 = vcmp.eq.s32.totalorder %v100_v11, %v106_v12 }
  0x5e   :  { %v114_v13 = vsel %vm111_vm2, %v83_v6, 0.0 }
  0x5f   :  { %v119_v14 = vsel %vm88_vm1, %v114_v13, 0.0 }
  0x60   :  { %120 = vadd.xlane.f32.xlu2 %v119_v14 }
  0x64   :  { %v109_v24 = vpop.permute.xlu2 %108 }
  0x65   :  { %vm112_vm4 = vcmp.eq.s32.totalorder %v100_v11, %v109_v24 }
  0x66   :  { %v115_v28 = vsel %vm112_vm4, %v84_v1, 0.0 }
  0x67   :  { %v122_v30 = vsel %vm95_vm0, %v115_v28, 0.0 }
  0x76   :  { %v98_v19 = vpop.xlane.xlu1 %97 }
  0x77   :  { %v91_v15 = vpop.xlane.xlu0 %90  ;;  %v127_v29 = vsub.f32 %v84_v1, %v98_v19 }
  0x78   :  { %v125_v22 = vsub.f32 %v82_v2, %v91_v15 }
  0x79   :  { %v132_v32 = vmul.f32 1.442695, %v127_v29 }
  0x7a   :  { %v128_v27 = vmul.f32 1.442695, %v125_v22 }
  0x7f   :  { %v94_v16 = vpop.xlane.xlu0 %93 }
  0x80   :  { %v126_v17 = vsub.f32 %v83_v6, %v94_v16 }
  0x82   :  { %v130_v18 = vmul.f32 1.442695, %v126_v17 }
  0x84   :  { %260 = vpow2.f32 %v130_v18 }
  0x85   :  { %262 = vpow2.f32 %v128_v27 }
  0x86   :  { %264 = vpow2.f32 %v132_v32 }
  0x8a   :  { %v261_v20 = vpop.eup %260 }
  0x8b   :  { %v137_v21 = vsel %vm88_vm1, %v261_v20, 0.0  ;;  %v263_v31 = vpop.eup %262  ;;  %v311_v20 = vmov 0.0  }
  0x8c   :  { %138 = vadd.xlane.f32.xlu1 %v137_v21  ;;  %v134_v33 = vsel %vm88_vm1, %v263_v31, 0.0  ;;  %v265_v34 = vpop.eup %264  ;;  %81 = vst.msk [vmem:[#allocation2] sm:$0x1] %vm80_vm8, %v311_v20 }
  0x8d   :  { %v140_v35 = vsel %vm95_vm0, %v265_v34, 0.0 }
  0x8e   :  { %v103_v23 = vpop.permute.xlu1 %102 }
  0x8f   :  { %vm110_vm3 = vcmp.eq.s32.totalorder %v100_v11, %v103_v23 }
  0x90   :  { %v113_v25 = vsel %vm110_vm3, %v82_v2, 0.0 }
  0x91   :  { %v116_v26 = vsel %vm88_vm1, %v113_v25, 0.0 }
  0x92   :  { %117 = vadd.xlane.f32.xlu0 %v116_v26 }
  0x93   :  { %v209_v27 = vld [vmem:[#allocation2] sm:$0x1] }
  0x9a   :  { %123 = vadd.xlane.f32.xlu0 %v122_v30 }
  0xa2   :  { %135 = vadd.xlane.f32.xlu0 %v134_v33 }
  0xaa   :  { %141 = vadd.xlane.f32.xlu0 %v140_v35 }
  0xd3   :  { %v121_v36 = vpop.xlane.xlu2 %120 }
  0xd4   :  { %v144_v38 = vsub.f32 %v121_v36, %v94_v16 }
  0xd6   :  { %v148_v40 = vmul.f32 1.442695, %v144_v38 }
  0xff   :  { %v139_v39 = vpop.xlane.xlu1 %138 }
 0x100   :  { %266 = vrcp.f32 %v139_v39 }
 0x101   :  { %268 = vpow2.f32 %v148_v40 }
 0x105   :  { %v118_v37 = vpop.xlane.xlu0 %117 }
 0x106   :  { %v143_v41 = vsub.f32 %v118_v37, %v91_v15  ;;  %v267_v44 = vpop.eup %266 }
 0x107   :  { %v269_v45 = vpop.eup %268 }
 0x108   :  { %v146_v43 = vmul.f32 1.442695, %v143_v41  ;;  %v156_v48 = vmul.f32 %v269_v45, %v267_v44 }
 0x10a   :  { %270 = vpow2.f32 %v146_v43  ;;  %v159_v50 = vsub.f32 1.0, %v156_v48 }
 0x10c   :  { %v162_v55 = vmul.f32 %v159_v50, %v156_v48 }
 0x10d   :  { %v124_v42 = vpop.xlane.xlu0 %123 }
 0x10e   :  { %v145_v46 = vsub.f32 %v124_v42, %v98_v19  ;;  %v165_v58 = vadd.f32 1.0, %v162_v55 }
 0x110   :  { %v150_v49 = vmul.f32 1.442695, %v145_v46  ;;  %v271_v51 = vpop.eup %270 }
 0x115   :  { %v136_v47 = vpop.xlane.xlu0 %135 }
 0x116   :  { %272 = vrcp.f32 %v136_v47 }
 0x117   :  { %274 = vpow2.f32 %v150_v49 }
 0x11c   :  { %v273_v52 = vpop.eup %272 }
 0x11d   :  { %v155_v53 = vmul.f32 %v273_v52, %v271_v51  ;;  %v142_v54 = vpop.xlane.xlu0 %141  ;;  %v275_v59 = vpop.eup %274 }
 0x11e   :  { %276 = vrcp.f32 %v142_v54 }
 0x11f   :  { %v158_v56 = vsub.f32 1.0, %v155_v53 }
 0x121   :  { %v161_v57 = vmul.f32 %v158_v56, %v155_v53 }
 0x123   :  { %v164_v60 = vadd.f32 1.0, %v161_v57 }
 0x124   :  { %v277_v61 = vpop.eup %276 }
 0x125   :  { %v157_v62 = vmul.f32 %v277_v61, %v275_v59  ;;  %278 = vrcp.f32 %v164_v60 }
 0x126   :  { %280 = vrcp.f32 %v165_v58 }
 0x127   :  { %v160_v63 = vsub.f32 1.0, %v157_v62 }
 0x129   :  { %v163_v0 = vmul.f32 %v160_v63, %v157_v62 }
 0x12b   :  { %v279_v1 = vpop.eup %278  ;;  %v166_v2 = vadd.f32 1.0, %v163_v0 }
 0x12c   :  { %v281_v3 = vpop.eup %280  ;;  %v170_v4 = vmul.f32 %v279_v1, %v161_v57 }
 0x12d   :  { %282 = vrcp.f32 %v166_v2  ;;  %v171_v6 = vmul.f32 %v281_v3, %v162_v55 }
 0x12e   :  { %v173_v7 = vsub.f32 1.0, %v170_v4 }
 0x12f   :  { %v174_v11 = vsub.f32 1.0, %v171_v6 }
 0x130   :  { %v193_v13 = vsel %vm192_vm5, %v173_v7, 0.0 }
 0x131   :  { %v194_v15 = vsel %vm192_vm5, %v174_v11, 0.0 }
 0x132   :  { %v195_v17 = vadd.f32 %v194_v15, %v193_v13 }
 0x133   :  { %v283_v9 = vpop.eup %282 }
 0x134   :  { %v172_v12 = vmul.f32 %v283_v9, %v163_v0 }
 0x136   :  { %v175_v14 = vsub.f32 1.0, %v172_v12 }
 0x138   :  { %v191_v16 = vsel %vm188_vm6, %v175_v14, 0.0 }
 0x139   :  { %v197_v18 = vsel %vm196_vm7, %v191_v16, 0.0 }
 0x13a   :  { %v198_v19 = vadd.f32 %v197_v18, %v195_v17 }
 0x13c   :  { %199 = vadd.xlane.f32.xlu0 %v198_v19 }
 0x1af   :  { %v200_v10 = vpop.xlane.xlu0 %199 }
 0x1b0   :  { %v201_v21 = vrot.slane %v200_v10, 4 }
 0x1b2   :  { %v202_v22 = vadd.f32 %v201_v21, %v200_v10 }
 0x1b4   :  { %v203_v23 = vrot.slane %v202_v22, 2 }
 0x1b6   :  { %v204_v24 = vadd.f32 %v203_v23, %v202_v22 }
 0x1b8   :  { %v205_v25 = vrot.slane %v204_v24, 1 }
 0x1ba   :  { %v206_v26 = vadd.f32 %v205_v25, %v204_v24 }
 0x1bc   :  { %252 = vpush %v206_v26 }
 0x1ed   :  { %s253_s0 = spop %252 }
 0x1ee   :  { %v208_v28 = vstv %s253_s0 }
 0x1ef   :  { %v210_v29 = vadd.f32 %v209_v27, %v208_v28 }
 0x1f1   :  { %212 = vst.msk [vmem:[#allocation2] sm:$0x1] %vm80_vm8, %v210_v29 }
 0x1f8   :  { %v216_v30 = vld [vmem:[#allocation2] sm:$0x1] }
 0x1f9   :  { %219 = vperm.xlu0 %259, %v216_v30  }
 0x26b   :  { %v220_v31 = vpop.permute.xlu0 %219 }
 0x26c   :  { %v222_v32 = vperm.slane %v220_v31, 0 }
 0x26e   :  { %223 = vst [vmem:[#allocation3] sm:$0x1] %v222_v32 }
 0x26f   :  { %234 = dma.vmem_to_hbm [thread:$0]  %s230_s21, 16, %s232_s24, [#allocation4]  }
 0x270   :  { %308 = dma.done.wait [#allocation4], 16  }
 0x271   :  { %309 = vsyncadd [#allocation4], 4294967280 }
 0x272   :  { %239 = vsyncpa [#allocation4], 1 }

</bundles_post_ra>
